<compile_context>
chip_gen: v7x
topology: tpu7x:2x2x1
jax: 0.10.0
libtpu: 0.0.40
codegen_flags: <defaults>
</compile_context>

<pallas_src>
import functools
import math

import jax
import jax.numpy as jnp
from jax.experimental import pallas as pl
from jax.experimental.pallas import tpu as pltpu

BN_EPS = 1e-5          # nn.BatchNorm1d default eps
NORMALIZE_EPS = 1e-12  # F.normalize default eps
ROT_WIDTH = 128        # lane-dense padded width of the 4-wide rot output


# ---------------------------------------------------------------------------
# Fused kernel
# ---------------------------------------------------------------------------
def _encode_project_kernel(h_ref, w1_ref, g1_ref, b1_ref, w2_ref, g2_ref,
                           wr_ref, br_ref, out_ref, acc_ref,
                           *, inv_sqrt_temp, emit_rot):
    """Grid axis 0 tiles the fc1 contraction (K).  Partial products are
    accumulated in f32 VMEM scratch; BN1/relu/fc2/BN2 (+ normalize + rot_head
    when emit_rot) run once at the last K step."""
    k = pl.program_id(0)

    @pl.when(k == 0)
    def _init():
        acc_ref[...] = jnp.zeros_like(acc_ref)

    # fc1 partial product: bf16 x bf16 on the MXU, f32 accumulation.
    acc_ref[...] += jnp.dot(h_ref[...], w1_ref[...],
                            preferred_element_type=jnp.float32)

    @pl.when(k == pl.num_programs(0) - 1)
    def _finalize():
        a1 = acc_ref[...]                                   # (B, D) f32
        inv_n = 1.0 / a1.shape[0]

        # bn1: train-mode batch stats, one pass (sum + sum-of-squares).
        s1 = jnp.sum(a1, axis=0, keepdims=True)
        q1 = jnp.sum(a1 * a1, axis=0, keepdims=True)
        mu1 = s1 * inv_n
        var1 = jnp.maximum(q1 * inv_n - mu1 * mu1, 0.0)
        scale1 = jax.lax.rsqrt(var1 + BN_EPS) * g1_ref[...]
        x1 = (a1 - mu1) * scale1 + b1_ref[...]
        x1 = jnp.maximum(x1, 0.0)                           # relu1

        # fc2: bf16 on the MXU, f32 accumulation.
        a2 = jnp.dot(x1.astype(jnp.bfloat16), w2_ref[...],
                     preferred_element_type=jnp.float32)

        # bn2 (BatchNorm1dNoBias: bias frozen at 0 -> scale only).
        s2 = jnp.sum(a2, axis=0, keepdims=True)
        q2 = jnp.sum(a2 * a2, axis=0, keepdims=True)
        mu2 = s2 * inv_n
        var2 = jnp.maximum(q2 * inv_n - mu2 * mu2, 0.0)
        z = (a2 - mu2) * (jax.lax.rsqrt(var2 + BN_EPS) * g2_ref[...])

        if emit_rot:
            # F.normalize(z, p=2, dim=1) / sqrt(T) via rsqrt (EUP slot).
            sq = jnp.sum(z * z, axis=1, keepdims=True)
            zn = z * (jax.lax.rsqrt(jnp.maximum(sq, NORMALIZE_EPS * NORMALIZE_EPS))
                      * inv_sqrt_temp)
            rot = jnp.dot(zn.astype(jnp.bfloat16), wr_ref[...],
                          preferred_element_type=jnp.float32) + br_ref[...]
            out_ref[...] = rot.astype(out_ref.dtype)        # lane-dense (B, 128)
        else:
            out_ref[...] = z.astype(out_ref.dtype)


# ---------------------------------------------------------------------------
# Wrapper module
# ---------------------------------------------------------------------------
class EncodeProjectPallas:
    """Pallas port of EncodeProject (projection + rot head paths)."""

    def __init__(self, key, encoder_dim=256, proj_dim=128, temperature=0.5):
        self.encoder_dim = encoder_dim
        self.proj_dim = proj_dim
        self.temperature = temperature
        self._tk = self._pick_tk(encoder_dim)

        k1, k2, k3, k4 = jax.random.split(key, 4)
        f32, bf16 = jnp.float32, jnp.bfloat16
        # torch Linear weights are (out, in); store pre-transposed (in, out),
        # quantized to bf16 for the MXU (f32 accumulation inside the kernel).
        self.w1_t = (jax.random.normal(k1, (encoder_dim, encoder_dim), f32)
                     * (1.0 / math.sqrt(encoder_dim))).astype(bf16)
        self.w2_t = (jax.random.normal(k2, (encoder_dim, proj_dim), f32)
                     * (1.0 / math.sqrt(encoder_dim))).astype(bf16)
        # BatchNorm affine params stay f32 (PyTorch init: weight=1, bias=0).
        self.g1 = jnp.ones((1, encoder_dim), f32)
        self.b1 = jnp.zeros((1, encoder_dim), f32)
        self.g2 = jnp.ones((1, proj_dim), f32)
        # (bn2 bias is BatchNorm1dNoBias: frozen at 0 -> not materialized)
        # rot head: Linear(128, 4) with bias, padded lane-dense to 128 cols.
        self.wr_t = (jax.random.normal(k3, (proj_dim, 4), f32)
                     * (1.0 / math.sqrt(proj_dim))).astype(bf16)
        self.br = (jax.random.normal(k4, (1, 4), f32)
                   * (1.0 / math.sqrt(proj_dim)))
        self.wr_pad = jnp.pad(self.wr_t, ((0, 0), (0, ROT_WIDTH - 4)))
        self.br_pad = jnp.pad(self.br, ((0, 0), (0, ROT_WIDTH - 4)))

    @staticmethod
    def _pick_tk(d):
        # Largest K tile that gives >= 2 pipeline steps; else single block.
        for tk in (512, 256, 128):
            if d % tk == 0 and d // tk >= 2:
                return tk
        return d

    def _vmem_limit(self, b):
        d, p, tk, w = self.encoder_dim, self.proj_dim, self._tk, ROT_WIDTH
        est = (2 * b * tk * 2          # h tiles (bf16, double-buffered)
               + 2 * tk * d * 2        # w1 tiles (bf16, double-buffered)
               + d * p * 2             # w2 (resident, bf16)
               + p * w * 2             # padded rot weights (bf16)
               + (2 * d + p + w) * 4   # bn params + rot bias (f32)
               + b * d * 4             # fc1 f32 accumulator scratch
               + 2 * b * w * 4         # output block
               + 4 * b * d * 4)        # finalize temporaries headroom
        return int(min(max(2 * est, 8 << 20), 64 << 20))

    def _run(self, h, emit_rot):
        b = h.shape[0]
        d, p, tk = self.encoder_dim, self.proj_dim, self._tk
        nk = d // tk
        out_cols = ROT_WIDTH if emit_rot else p
        full = lambda k: (0, 0)

        kern = functools.partial(
            _encode_project_kernel,
            inv_sqrt_temp=float(1.0 / math.sqrt(self.temperature)),
            emit_rot=emit_rot)

        result = pl.pallas_call(
            kern,
            out_shape=jax.ShapeDtypeStruct((b, out_cols), jnp.float32),
            grid_spec=pltpu.PrefetchScalarGridSpec(
                num_scalar_prefetch=0,
                grid=(nk,),
                in_specs=[
                    pl.BlockSpec((b, tk), lambda k: (0, k)),      # h (batch untiled!)
                    pl.BlockSpec((tk, d), lambda k: (k, 0)),      # w1_t K-blocked
                    pl.BlockSpec((1, d), full),                   # g1
                    pl.BlockSpec((1, d), full),                   # b1
                    pl.BlockSpec((d, p), full),                   # w2_t
                    pl.BlockSpec((1, p), full),                   # g2
                    pl.BlockSpec((p, ROT_WIDTH), full),           # wr (padded)
                    pl.BlockSpec((1, ROT_WIDTH), full),           # br (padded)
                ],
                out_specs=pl.BlockSpec((b, out_cols), full),
                scratch_shapes=[pltpu.VMEM((b, d), jnp.float32)],
            ),
            compiler_params=pltpu.CompilerParams(
                dimension_semantics=("arbitrary",),   # K is a reduction axis
                vmem_limit_bytes=self._vmem_limit(b),
            ),
        )(h.astype(jnp.bfloat16), self.w1_t, self.g1, self.b1,
          self.w2_t, self.g2, self.wr_pad, self.br_pad)

        if emit_rot:
            return result[:, :4]
        return result

    def __call__(self, h, out='z'):
        # h plays the role of convnet(x); see TODO(synk) at top of file.
        if out == 'h':
            return h
        return self._run(h, emit_rot=(out == 'rot'))


# ---------------------------------------------------------------------------
# Pure-JAX reference (mirrors the kernel's mixed-precision policy: bf16 matmul
# operands, f32 accumulation / BN / normalize math)
# ---------------------------------------------------------------------------
def _reference(model, h, out='z'):
    f32 = jnp.float32
    hi = jax.lax.Precision.HIGHEST
    w1 = model.w1_t.astype(f32)
    w2 = model.w2_t.astype(f32)
    wr = model.wr_t.astype(f32)

    a1 = jnp.dot(h.astype(jnp.bfloat16).astype(f32), w1, precision=hi)
    mu1 = a1.mean(0, keepdims=True)
    v1 = ((a1 - mu1) ** 2).mean(0, keepdims=True)
    x1 = (a1 - mu1) * jax.lax.rsqrt(v1 + BN_EPS) * model.g1 + model.b1
    x1 = jnp.maximum(x1, 0.0)
    a2 = jnp.dot(x1.astype(jnp.bfloat16).astype(f32), w2, precision=hi)
    mu2 = a2.mean(0, keepdims=True)
    v2 = ((a2 - mu2) ** 2).mean(0, keepdims=True)
    z = (a2 - mu2) * jax.lax.rsqrt(v2 + BN_EPS) * model.g2
    if out == 'z':
        return z
    norm = jnp.sqrt(jnp.sum(z * z, axis=1, keepdims=True))
    zn = z / jnp.maximum(norm, NORMALIZE_EPS) / math.sqrt(model.temperature)
    return jnp.dot(zn.astype(jnp.bfloat16).astype(f32), wr, precision=hi) + model.br


if __name__ == "__main__":
    key = jax.random.PRNGKey(0)
    k_param, k_feat = jax.random.split(key)

    BATCH = 8
    ENCODER_DIM = 256   # small stand-in for ResNet18's 512 / ResNet50's 2048
    model = EncodeProjectPallas(k_param, encoder_dim=ENCODER_DIM,
                                proj_dim=128, temperature=0.5)

    # h = convnet(x) stand-in features (see TODO(synk) above).
    h = jax.random.normal(k_feat, (BATCH, ENCODER_DIM), jnp.float32)

    z = model(h, out='z')
    rot = model(h, out='rot')
    jax.block_until_ready((z, rot))

    assert z.shape == (BATCH, 128) and rot.shape == (BATCH, 4)
    assert bool(jnp.all(jnp.isfinite(z))) and bool(jnp.all(jnp.isfinite(rot)))

    z_ref = _reference(model, h, out='z')
    rot_ref = _reference(model, h, out='rot')
    assert bool(jnp.allclose(z, z_ref, rtol=1e-2, atol=1e-2)), "z mismatch"
    assert bool(jnp.allclose(rot, rot_ref, rtol=1e-2, atol=1e-2)), "rot mismatch"

    print("KERNEL_OK")
</pallas_src>

<mosaic_0001>
module attributes {stable_mosaic.version = 11 : i64} {
  func.func @_encode_project_kernel(%arg0: i32, %arg1: memref<8x128xbf16, #tpu.memory_space<vmem>>, %arg2: memref<128x256xbf16, #tpu.memory_space<vmem>>, %arg3: memref<1x256xf32, #tpu.memory_space<vmem>>, %arg4: memref<1x256xf32, #tpu.memory_space<vmem>>, %arg5: memref<256x128xbf16, #tpu.memory_space<vmem>>, %arg6: memref<1x128xf32, #tpu.memory_space<vmem>>, %arg7: memref<128x128xbf16, #tpu.memory_space<vmem>>, %arg8: memref<1x128xf32, #tpu.memory_space<vmem>>, %arg9: memref<8x128xf32, #tpu.memory_space<vmem>>, %arg10: memref<8x256xf32, #tpu.memory_space<vmem>>) attributes {dimension_semantics = [#tpu.dimension_semantics<arbitrary>], iteration_bounds = array<i64: 2>, scalar_prefetch = 0 : i64, scratch_operands = 1 : i64, tpu.core_type = #tpu.core_type<tc>, window_params = [{transform_indices = @transform_0, window_bounds = array<i64: 8, 128>}, {transform_indices = @transform_1, window_bounds = array<i64: 128, 256>}, {pipeline_mode = #tpu.pipeline_mode<synchronous>, transform_indices = @transform_2, window_bounds = array<i64: 1, 256>}, {pipeline_mode = #tpu.pipeline_mode<synchronous>, transform_indices = @transform_3, window_bounds = array<i64: 1, 256>}, {pipeline_mode = #tpu.pipeline_mode<synchronous>, transform_indices = @transform_4, window_bounds = array<i64: 256, 128>}, {pipeline_mode = #tpu.pipeline_mode<synchronous>, transform_indices = @transform_5, window_bounds = array<i64: 1, 128>}, {pipeline_mode = #tpu.pipeline_mode<synchronous>, transform_indices = @transform_6, window_bounds = array<i64: 128, 128>}, {pipeline_mode = #tpu.pipeline_mode<synchronous>, transform_indices = @transform_7, window_bounds = array<i64: 1, 128>}, {pipeline_mode = #tpu.pipeline_mode<synchronous>, transform_indices = @transform_8, window_bounds = array<i64: 8, 128>}]} {
    %c0_i32 = arith.constant 0 : i32
    %0 = arith.cmpi eq, %arg0, %c0_i32 : i32
    %1 = arith.extui %0 : i1 to i32
    %c0_i32_0 = arith.constant 0 : i32
    %2 = arith.cmpi ne, %1, %c0_i32_0 : i32
    scf.if %2 {
      %cst_9 = arith.constant 0.000000e+00 : f32
      %12 = vector.broadcast %cst_9 : f32 to vector<8x256xf32>
      %c0_10 = arith.constant 0 : index
      %c0_11 = arith.constant 0 : index
      %13 = vector.load %arg10[%c0_10, %c0_11] : memref<8x256xf32, #tpu.memory_space<vmem>>, vector<8x256xf32>
      tpu.vector_store %arg10[%c0_10, %c0_11], %12 {strides = array<i32>} : memref<8x256xf32, #tpu.memory_space<vmem>>, vector<8x256xf32>,
    } else {
    }
    %c0 = arith.constant 0 : index
    %c0_1 = arith.constant 0 : index
    %3 = vector.load %arg10[%c0, %c0_1] : memref<8x256xf32, #tpu.memory_space<vmem>>, vector<8x256xf32>
    %c0_2 = arith.constant 0 : index
    %c0_3 = arith.constant 0 : index
    %4 = vector.load %arg1[%c0_2, %c0_3] : memref<8x128xbf16, #tpu.memory_space<vmem>>, vector<8x128xbf16>
    %c0_4 = arith.constant 0 : index
    %c0_5 = arith.constant 0 : index
    %5 = vector.load %arg2[%c0_4, %c0_5] : memref<128x256xbf16, #tpu.memory_space<vmem>>, vector<128x256xbf16>
    %cst = arith.constant dense<0.000000e+00> : vector<8x256xf32>
    %6 = tpu.matmul %4, %5, %cst {dimension_numbers = #tpu.dot_dimension_numbers<[1], [0], [0], [1], [0, 0, 1, 1], [], []>} : vector<8x128xbf16>, vector<128x256xbf16>, vector<8x256xf32> -> vector<8x256xf32>
    %7 = arith.addf %3, %6 : vector<8x256xf32>
    %c0_6 = arith.constant 0 : index
    %c0_7 = arith.constant 0 : index
    %8 = vector.load %arg10[%c0_6, %c0_7] : memref<8x256xf32, #tpu.memory_space<vmem>>, vector<8x256xf32>
    tpu.vector_store %arg10[%c0_6, %c0_7], %7 {strides = array<i32>} : memref<8x256xf32, #tpu.memory_space<vmem>>, vector<8x256xf32>,
    %c1_i32 = arith.constant 1 : i32
    %9 = arith.cmpi eq, %arg0, %c1_i32 : i32
    %10 = arith.extui %9 : i1 to i32
    %c0_i32_8 = arith.constant 0 : i32
    %11 = arith.cmpi ne, %10, %c0_i32_8 : i32
    scf.if %11 {
      %c0_9 = arith.constant 0 : index
      %c0_10 = arith.constant 0 : index
      %12 = vector.load %arg10[%c0_9, %c0_10] : memref<8x256xf32, #tpu.memory_space<vmem>>, vector<8x256xf32>
      %cst_11 = arith.constant dense<0.000000e+00> : vector<256xf32>
      %13 = vector.multi_reduction <add>, %12, %cst_11 [0] : vector<8x256xf32> to vector<256xf32>
      %14 = vector.shape_cast %13 : vector<256xf32> to vector<1x256xf32>
      %15 = arith.mulf %12, %12 : vector<8x256xf32>
      %cst_12 = arith.constant dense<0.000000e+00> : vector<256xf32>
      %16 = vector.multi_reduction <add>, %15, %cst_12 [0] : vector<8x256xf32> to vector<256xf32>
      %17 = vector.shape_cast %16 : vector<256xf32> to vector<1x256xf32>
      %cst_13 = arith.constant 1.250000e-01 : f32
      %18 = vector.broadcast %cst_13 : f32 to vector<1x256xf32>
      %19 = arith.mulf %14, %18 : vector<1x256xf32>
      %cst_14 = arith.constant 1.250000e-01 : f32
      %20 = vector.broadcast %cst_14 : f32 to vector<1x256xf32>
      %21 = arith.mulf %17, %20 : vector<1x256xf32>
      %22 = arith.mulf %19, %19 : vector<1x256xf32>
      %23 = arith.subf %21, %22 : vector<1x256xf32>
      %cst_15 = arith.constant 0.000000e+00 : f32
      %24 = vector.broadcast %cst_15 : f32 to vector<1x256xf32>
      %25 = arith.maximumf %23, %24 : vector<1x256xf32>
      %cst_16 = arith.constant 9.99999974E-6 : f32
      %26 = vector.broadcast %cst_16 : f32 to vector<1x256xf32>
      %27 = arith.addf %25, %26 : vector<1x256xf32>
      %28 = math.rsqrt %27 : vector<1x256xf32>
      %c0_17 = arith.constant 0 : index
      %c0_18 = arith.constant 0 : index
      %29 = vector.load %arg3[%c0_17, %c0_18] : memref<1x256xf32, #tpu.memory_space<vmem>>, vector<1x256xf32>
      %30 = arith.mulf %28, %29 : vector<1x256xf32>
      %31 = vector.broadcast %19 : vector<1x256xf32> to vector<8x256xf32>
      %32 = arith.subf %12, %31 : vector<8x256xf32>
      %33 = vector.broadcast %30 : vector<1x256xf32> to vector<8x256xf32>
      %34 = arith.mulf %32, %33 : vector<8x256xf32>
      %c0_19 = arith.constant 0 : index
      %c0_20 = arith.constant 0 : index
      %35 = vector.load %arg4[%c0_19, %c0_20] : memref<1x256xf32, #tpu.memory_space<vmem>>, vector<1x256xf32>
      %36 = vector.broadcast %35 : vector<1x256xf32> to vector<8x256xf32>
      %37 = arith.addf %34, %36 : vector<8x256xf32>
      %cst_21 = arith.constant 0.000000e+00 : f32
      %38 = vector.broadcast %cst_21 : f32 to vector<8x256xf32>
      %39 = arith.maximumf %37, %38 : vector<8x256xf32>
      %40 = arith.truncf %39 : vector<8x256xf32> to vector<8x256xbf16>
      %c0_22 = arith.constant 0 : index
      %c0_23 = arith.constant 0 : index
      %41 = vector.load %arg5[%c0_22, %c0_23] : memref<256x128xbf16, #tpu.memory_space<vmem>>, vector<256x128xbf16>
      %cst_24 = arith.constant dense<0.000000e+00> : vector<8x128xf32>
      %42 = tpu.matmul %40, %41, %cst_24 {dimension_numbers = #tpu.dot_dimension_numbers<[1], [0], [0], [1], [0, 0, 1, 1], [], []>} : vector<8x256xbf16>, vector<256x128xbf16>, vector<8x128xf32> -> vector<8x128xf32>
      %cst_25 = arith.constant dense<0.000000e+00> : vector<128xf32>
      %43 = vector.multi_reduction <add>, %42, %cst_25 [0] : vector<8x128xf32> to vector<128xf32>
      %44 = vector.shape_cast %43 : vector<128xf32> to vector<1x128xf32>
      %45 = arith.mulf %42, %42 : vector<8x128xf32>
      %cst_26 = arith.constant dense<0.000000e+00> : vector<128xf32>
      %46 = vector.multi_reduction <add>, %45, %cst_26 [0] : vector<8x128xf32> to vector<128xf32>
      %47 = vector.shape_cast %46 : vector<128xf32> to vector<1x128xf32>
      %cst_27 = arith.constant 1.250000e-01 : f32
      %48 = vector.broadcast %cst_27 : f32 to vector<1x128xf32>
      %49 = arith.mulf %44, %48 : vector<1x128xf32>
      %cst_28 = arith.constant 1.250000e-01 : f32
      %50 = vector.broadcast %cst_28 : f32 to vector<1x128xf32>
      %51 = arith.mulf %47, %50 : vector<1x128xf32>
      %52 = arith.mulf %49, %49 : vector<1x128xf32>
      %53 = arith.subf %51, %52 : vector<1x128xf32>
      %cst_29 = arith.constant 0.000000e+00 : f32
      %54 = vector.broadcast %cst_29 : f32 to vector<1x128xf32>
      %55 = arith.maximumf %53, %54 : vector<1x128xf32>
      %56 = vector.broadcast %49 : vector<1x128xf32> to vector<8x128xf32>
      %57 = arith.subf %42, %56 : vector<8x128xf32>
      %cst_30 = arith.constant 9.99999974E-6 : f32
      %58 = vector.broadcast %cst_30 : f32 to vector<1x128xf32>
      %59 = arith.addf %55, %58 : vector<1x128xf32>
      %60 = math.rsqrt %59 : vector<1x128xf32>
      %c0_31 = arith.constant 0 : index
      %c0_32 = arith.constant 0 : index
      %61 = vector.load %arg6[%c0_31, %c0_32] : memref<1x128xf32, #tpu.memory_space<vmem>>, vector<1x128xf32>
      %62 = arith.mulf %60, %61 : vector<1x128xf32>
      %63 = vector.broadcast %62 : vector<1x128xf32> to vector<8x128xf32>
      %64 = arith.mulf %57, %63 : vector<8x128xf32>
      %c0_33 = arith.constant 0 : index
      %c0_34 = arith.constant 0 : index
      %65 = vector.load %arg9[%c0_33, %c0_34] : memref<8x128xf32, #tpu.memory_space<vmem>>, vector<8x128xf32>
      tpu.vector_store %arg9[%c0_33, %c0_34], %64 {strides = array<i32>} : memref<8x128xf32, #tpu.memory_space<vmem>>, vector<8x128xf32>,
    } else {
    }
    return
  }
  func.func @transform_0(%arg0: i32) -> (i32, i32) {
    %c0_i32 = arith.constant 0 : i32
    %c0_i32_0 = arith.constant 0 : i32
    return %c0_i32, %arg0 : i32, i32
  }
  func.func @transform_1(%arg0: i32) -> (i32, i32) {
    %c0_i32 = arith.constant 0 : i32
    %c0_i32_0 = arith.constant 0 : i32
    return %arg0, %c0_i32 : i32, i32
  }
  func.func @transform_2(%arg0: i32) -> (i32, i32) {
    %c0_i32 = arith.constant 0 : i32
    %c0_i32_0 = arith.constant 0 : i32
    %c0_i32_1 = arith.constant 0 : i32
    return %c0_i32, %c0_i32_0 : i32, i32
  }
  func.func @transform_3(%arg0: i32) -> (i32, i32) {
    %c0_i32 = arith.constant 0 : i32
    %c0_i32_0 = arith.constant 0 : i32
    %c0_i32_1 = arith.constant 0 : i32
    return %c0_i32, %c0_i32_0 : i32, i32
  }
  func.func @transform_4(%arg0: i32) -> (i32, i32) {
    %c0_i32 = arith.constant 0 : i32
    %c0_i32_0 = arith.constant 0 : i32
    %c0_i32_1 = arith.constant 0 : i32
    return %c0_i32, %c0_i32_0 : i32, i32
  }
  func.func @transform_5(%arg0: i32) -> (i32, i32) {
    %c0_i32 = arith.constant 0 : i32
    %c0_i32_0 = arith.constant 0 : i32
    %c0_i32_1 = arith.constant 0 : i32
    return %c0_i32, %c0_i32_0 : i32, i32
  }
  func.func @transform_6(%arg0: i32) -> (i32, i32) {
    %c0_i32 = arith.constant 0 : i32
    %c0_i32_0 = arith.constant 0 : i32
    %c0_i32_1 = arith.constant 0 : i32
    return %c0_i32, %c0_i32_0 : i32, i32
  }
  func.func @transform_7(%arg0: i32) -> (i32, i32) {
    %c0_i32 = arith.constant 0 : i32
    %c0_i32_0 = arith.constant 0 : i32
    %c0_i32_1 = arith.constant 0 : i32
    return %c0_i32, %c0_i32_0 : i32, i32
  }
  func.func @transform_8(%arg0: i32) -> (i32, i32) {
    %c0_i32 = arith.constant 0 : i32
    %c0_i32_0 = arith.constant 0 : i32
    %c0_i32_1 = arith.constant 0 : i32
    return %c0_i32, %c0_i32_0 : i32, i32
  }
}

</mosaic_0001>

<bundles_post_ra>
// kernel: tpu_custom_call.1
= control target key start
LH: loop header
LB: loop body
LE: loop exit
PB: predicated region body
PF: predicated region fallthrough
CT: control target
= control target key end

     0   :  { %13 = vsyncpa [#allocation4], 0  ;;  %s1658_s0 = inlined_call_operand.hbm [shape: bf16[8,256], index: 0, kind: input, shape index: {}]   ;;  %s1659_s1 = inlined_call_operand.hbm [shape: bf16[256,256], index: 1, kind: input, shape index: {}]   ;;  %s1660_s2 = inlined_call_operand.vmem [shape: f32[1,256], index: 2, kind: input, shape index: {}]   ;;  %s1661_s3 = inlined_call_operand.vmem [shape: f32[1,256], index: 3, kind: input, shape index: {}]   ;;  %s1662_s4 = inlined_call_operand.hbm [shape: bf16[256,128], index: 4, kind: input, shape index: {}]   ;;  %s1663_s5 = inlined_call_operand.vmem [shape: f32[1,128], index: 5, kind: input, shape index: {}]   ;;  %s1664_s6 = inlined_call_operand.hbm [shape: bf16[128,128], index: 6, kind: input, shape index: {}]   ;;  %s1665_s7 = inlined_call_operand.vmem [shape: f32[1,128], index: 7, kind: input, shape index: {}]   ;;  %s1666_s8 = inlined_call_operand.hbm [shape: f32[8,128], index: 8, kind: output, shape index: {}]  }
   0x1   :  { %15 = vsyncpa [#allocation4 + $0x1], 0 }
   0x2   :  { %16 = vsyncpa [#allocation7], 0 }
   0x3   :  { %18 = vsyncpa [#allocation7 + $0x1], 0 }
   0x4   :  { %19 = vsyncpa [#allocation10], 0 }
   0x5   :  { %20 = vsyncpa [#allocation5], 0  ;;  %s1369_s27 = smov 0   ;;  %s1371_s28 = smov 0  }
   0x6   :  { %s1373_s29 = smov 0   ;;  %s1375_s30 = smov 0  }
   0x7 LB: > { %s1388_s7 = sadd.s32 4294967295, %s1311_s30   ;;  %p46_p0 = scmp.ne.s32.totalorder %s1303_s28, %s1299_s27  ;;  %s1311_s30 = sphi %s1375_s30, %s1684_s30   ;;  %s1307_s29 = sphi %s1373_s29, %s1683_s29   ;;  %s1303_s28 = sphi %s1371_s28, %s1682_s28   ;;  %s1299_s27 = sphi %s1369_s27, %s1681_s27  }
   0x8   : > { %p1667_p1 = scmp.eq.s32.totalorder %s1388_s7, 0  ;;  %p918_p2 = scmp.ge.s32.totalorder %s1311_s30, 1 }
   0x9   : > { %p230_p3 = scmp.lt.s32.totalorder %s1311_s30, 3  ;;  %s1313_s11 = smov [#allocation8]  }
   0xa   : > { %p1397_p5 = por %p1667_p1, %p46_p0  ;;  %s248_s12 = sshll.u32 %s1313_s11, 4  ;;  %s249_s12 = int_to_ptr.vmem [resolvable:$true] %s248_s12 }
   0xb   : > { %p1401_p6 = pnand %p918_p2, %p230_p3  ;;  %s1314_s14 = smov [#allocation9]  }
   0xc   : > { %s1670_s9 = scalar_select %p1397_p5, 1, 0 }
   0xd   : > { %s1671_s10 = scalar_select %p1401_p6, 1, 0 }
   0xe   : > { %p1011_p7 = pneg %p1401_p6  ;;  %s264_s15 = sshll.u32 %s1314_s14, 4  ;;  %s1413_s15 = int_to_ptr.vmem [resolvable:$true] %s264_s15 }
   0xf   : > { %s1119_s18 = scalar_lea.hbm %s1662_s4, 2048 }
  0x10   : > { %p1409_p8 = pnand %p1011_p7, %p1667_p1  ;;  %p1120_p9 = scmp.ne.s32.totalorder %s1662_s4, %s1119_s18 }
  0x11   : > { %p1126_p13 = scmp.lt.u32.totalorder %s1119_s18, %s1662_s4 }
  0x12   : > { %p1121_p10 = pneg %p1409_p8 }
  0x14   : > { %p1122_p11 = pnand %p1121_p10, %p1120_p9 }
  0x16   : > { %p1123_p12 = pneg %p1122_p11 }
  0x18   : > { %p1128_p0 = pnand %p1126_p13, %p1123_p12 }
  0x1a   : > { %1131 = shalt.err (!%p1128_p0)
}
  0x1b   : > { %s1132_s23 = scalar_lea.vmem %s249_s12, 2048  ;;  %p1140_p4 = scmp.lt.s32.totalorder %s249_s12, %s249_s12 }
  0x1c   : > { %p1133_p2 = scmp.ne.s32.totalorder %s249_s12, %s1132_s23  ;;  %p1141_p1 = scmp.lt.s32.totalorder %s1132_s23, %s1132_s23 }
  0x1e   : > { %p1135_p3 = pnand %p1133_p2, %p1121_p10  ;;  %p1142_p5 = por %p1141_p1, %p1140_p4 }
  0x20   : > { %p1136_p7 = pneg %p1135_p3 }
  0x22   : > { %p1143_p6 = pnand %p1142_p5, %p1136_p7 }
  0x24   : > { %1146 = shalt.err (!%p1143_p6)
}
  0x25   : > { %s1315_s24 = smov 64   ;;  %s1316_s25 = smov 4  }
  0x26   : > { %1014 = dma.hbm_to_vmem [thread:$0]  (!%p1409_p8), %s1662_s4, 2048, %s249_s12, [#allocation7], %s1315_s24, %s1315_s24, %s1316_s25  }
  0x27   : > { %s1147_s16 = scalar_lea.hbm %s1664_s6, 1024 }
  0x28   : > { %p1148_p9 = scmp.ne.s32.totalorder %s1664_s6, %s1147_s16  ;;  %p1154_p5 = scmp.lt.u32.totalorder %s1147_s16, %s1664_s6 }
  0x2a   : > { %p1150_p1 = pnand %p1148_p9, %p1121_p10 }
  0x2c   : > { %p1151_p4 = pneg %p1150_p1 }
  0x2e   : > { %p1156_p6 = pnand %p1154_p5, %p1151_p4 }
  0x30   : > { %1159 = shalt.err (!%p1156_p6)
}
  0x31   : > { %s1160_s12 = scalar_lea.vmem %s1413_s15, 1024  ;;  %p1168_p0 = scmp.lt.s32.totalorder %s1413_s15, %s1413_s15 }
  0x32   : > { %p1161_p11 = scmp.ne.s32.totalorder %s1413_s15, %s1160_s12  ;;  %p1169_p2 = scmp.lt.s32.totalorder %s1160_s12, %s1160_s12 }
  0x34   : > { %p1163_p12 = pnand %p1161_p11, %p1121_p10  ;;  %p1170_p3 = por %p1169_p2, %p1168_p0 }
  0x36   : > { %p1164_p13 = pneg %p1163_p12 }
  0x38   : > { %p1171_p7 = pnand %p1170_p3, %p1164_p13 }
  0x3a   : > { %1174 = shalt.err (!%p1171_p7)
}
  0x3b   : > { %1017 = dma.hbm_to_vmem [thread:$0]  (!%p1409_p8), %s1664_s6, 1024, %s1413_s15, [#allocation10], %s1315_s24, %s1315_s24, %s1316_s25  }
  0x3c   : > { %s1463_s23 = sadd.s32 1, %s1311_s30   ;;  %s33_s26 = sadd.s32 1, %s1307_s29 }
  0x3d   : > { %s30_s13 = ssub.s32 %s1311_s30, %s1463_s23  ;;  %p40_p10 = scmp.ne.s32.totalorder %s1307_s29, %s1303_s28 }
  0x3e   : > { %p31_p9 = scmp.eq.s32.totalorder %s30_s13, 0  ;;  %p41_p1 = scmp.eq.s32.totalorder %s1311_s30, 0 }
  0x3f   : > { %p1027_p4 = scmp.lt.s32.totalorder %s1311_s30, 2  ;;  %s1473_s27 = sand.u32 1, %s1307_s29  }
  0x40   : > { %s1476_s11 = scalar_select %p31_p9, %s1307_s29, %s33_s26  }
  0x41   : > { %p42_p5 = por %p41_p1, %p40_p10  ;;  %s922_s14 = sshll.u32 %s1473_s27, 2 }
  0x42   : > { %s923_s16 = sshll.u32 %s1311_s30, 6  ;;  %s285_s17 = scalar_lea.vmem [#allocation3], %s922_s14 }
  0x43   : > { %s1483_s25 = scalar_lea.hbm %s1658_s0, %s923_s16  ;;  %s292_s18 = sshll.u32 %s285_s17, 4  ;;  %s1489_s18 = int_to_ptr.vmem [resolvable:$true] %s292_s18 }
  0x44   : > { %p1485_p8 = pnand %p1027_p4, %p42_p5  ;;  %s924_s20 = sshll.u32 %s1473_s27, 7 }
  0x45   : > { %s282_s12 = scalar_lea.sflag [#allocation4], %s1473_s27  ;;  %s1175_s21 = scalar_lea.hbm %s1483_s25, 64 }
  0x46   : > { %p1176_p6 = scmp.ne.s32.totalorder %s1483_s25, %s1175_s21  ;;  %p1177_p11 = pneg %p1485_p8 }
  0x47   : > { %s1180_s13 = scalar_lea.hbm %s1658_s0, 128  ;;  %p1181_p0 = scmp.lt.u32.totalorder %s1483_s25, %s1658_s0 }
  0x48   : > { %p1178_p12 = pnand %p1177_p11, %p1176_p6  ;;  %p1182_p2 = scmp.lt.u32.totalorder %s1180_s13, %s1175_s21 }
  0x49   : > { %p1184_p7 = scmp.lt.u32.totalorder %s1175_s21, %s1483_s25 }
  0x4a   : > { %p1179_p13 = pneg %p1178_p12  ;;  %p1183_p3 = por %p1182_p2, %p1181_p0 }
  0x4c   : > { %p1185_p10 = por %p1184_p7, %p1183_p3 }
  0x4e   : > { %p1186_p9 = pnand %p1185_p10, %p1179_p13 }
  0x50   : > { %1189 = shalt.err (!%p1186_p9)
}
  0x51   : > { %s1190_s15 = scalar_lea.vmem %s1489_s18, 64  ;;  %s1317_s24 = smov [#allocation3]  }
  0x52   : > { %p1191_p1 = scmp.ne.s32.totalorder %s1489_s18, %s1190_s15  ;;  %s1195_s17 = sshll.u32 %s1317_s24, 4  ;;  %s1196_s17 = int_to_ptr.vmem [resolvable:$false] %s1195_s17 }
  0x53   : > { %s1197_s22 = scalar_lea.vmem %s1196_s17, 128  ;;  %p1198_p6 = scmp.lt.s32.totalorder %s1489_s18, %s1196_s17 }
  0x54   : > { %p1193_p4 = pnand %p1191_p1, %p1177_p11  ;;  %p1199_p12 = scmp.lt.s32.totalorder %s1197_s22, %s1190_s15 }
  0x56   : > { %p1194_p5 = pneg %p1193_p4  ;;  %p1200_p0 = por %p1199_p12, %p1198_p6 }
  0x58   : > { %p1201_p2 = pnand %p1200_p0, %p1194_p5 }
  0x5a   : > { %1204 = shalt.err (!%p1201_p2)
}
  0x5b   : > { %1021 = dma.hbm_to_vmem [thread:$0]  (!%p1485_p8), %s1483_s25, 64, %s1489_s18, %s282_s12  }
  0x5c   : > { %s303_s21 = scalar_lea.vmem [#allocation6], %s924_s20  ;;  %s299_s13 = sand.u32 1, %s1311_s30  }
  0x5d   : > { %s311_s26 = sshll.u32 %s303_s21, 4  ;;  %s972_s14 = sshll.u32 %s1311_s30, 11  ;;  %s1521_s26 = int_to_ptr.vmem [resolvable:$true] %s311_s26 }
  0x5e   : > { %s1527_s24 = scalar_lea.hbm %s1659_s1, %s972_s14  ;;  %s1529_s17 = scalar_lea.sflag [#allocation7], %s299_s13 }
  0x5f   : > { %s1205_s22 = scalar_lea.hbm %s1527_s24, 2048  ;;  %s1210_s30 = scalar_lea.hbm %s1659_s1, 4096 }
  0x60   : > { %p1206_p13 = scmp.ne.s32.totalorder %s1527_s24, %s1205_s22  ;;  %p1211_p10 = scmp.lt.u32.totalorder %s1527_s24, %s1659_s1 }
  0x61   : > { %p1212_p9 = scmp.lt.u32.totalorder %s1210_s30, %s1205_s22  ;;  %p1214_p4 = scmp.lt.u32.totalorder %s1205_s22, %s1527_s24 }
  0x62   : > { %p1208_p3 = pnand %p1206_p13, %p1177_p11 }
  0x63   : > { %p1213_p1 = por %p1212_p9, %p1211_p10 }
  0x64   : > { %p1209_p7 = pneg %p1208_p3 }
  0x65   : > { %p1215_p5 = por %p1214_p4, %p1213_p1 }
  0x67   : > { %p1216_p6 = pnand %p1215_p5, %p1209_p7 }
  0x69   : > { %1219 = shalt.err (!%p1216_p6)
}
  0x6a   : > { %s1220_s12 = scalar_lea.vmem %s1521_s26, 2048  ;;  %s1318_s21 = smov [#allocation6]  }
  0x6b   : > { %p1221_p12 = scmp.ne.s32.totalorder %s1521_s26, %s1220_s12  ;;  %s1225_s13 = sshll.u32 %s1318_s21, 4  ;;  %s1226_s13 = int_to_ptr.vmem [resolvable:$false] %s1225_s13 }
  0x6c   : > { %s1227_s14 = scalar_lea.vmem %s1226_s13, 4096  ;;  %p1228_p13 = scmp.lt.s32.totalorder %s1521_s26, %s1226_s13 }
  0x6d   : > { %p1223_p0 = pnand %p1221_p12, %p1177_p11  ;;  %p1229_p3 = scmp.lt.s32.totalorder %s1227_s14, %s1220_s12 }
  0x6f   : > { %p1224_p2 = pneg %p1223_p0  ;;  %p1230_p10 = por %p1229_p3, %p1228_p13 }
  0x71   : > { %p1231_p9 = pnand %p1230_p10, %p1224_p2 }
  0x73   : > { %1234 = shalt.err (!%p1231_p9)
}
  0x74   : > { %s1319_s16 = smov 128   ;;  %s1320_s15 = smov 8  }
  0x75   : > { %1024 = dma.hbm_to_vmem [thread:$0]  (!%p1485_p8), %s1527_s24, 2048, %s1521_s26, %s1529_s17, %s1319_s16, %s1319_s16, %s1320_s15  }
  0x76   : > { %p1674_p11 = scmp.ne.s32.totalorder %s1671_s10, 0 }
  0x77   : > { %s325_s22 = sand.u32 (!%p1674_p11), 1, %s1303_s28   ;;  %p1675_p7 = scmp.ne.s32.totalorder (!%p1674_p11), %s1670_s9, 0 }
  0x78   : > { %323 = sbr.rel (%p1674_p11) target bundleno = 729 (0x2d9), region = 52  ;;  %s929_s27 = sshll.u32 (!%p1674_p11), %s325_s22, 2 }
  0x79   : > { %s326_s25 = scalar_lea.sflag (!%p1674_p11), [#allocation4], %s325_s22  ;;  %s1558_s30 = scalar_lea.vmem (!%p1674_p11), [#allocation3], %s929_s27 }
  0x7f   : > { %1278 = dma.done.wait (%p1675_p7), %s326_s25, 64  }
  0x80   : > { %1280 = vsyncadd (%p1675_p7), %s326_s25, 4294967232  ;;  %s334_s18 = sand.u32 1, %s1388_s7   ;;  %s930_s19 = sshll.u32 %s325_s22, 7 }
  0x81   : > { %s335_s26 = scalar_lea.sflag [#allocation7], %s334_s18  ;;  %s1565_s24 = scalar_lea.vmem [#allocation6], %s930_s19 }
  0x82   : > { %1282 = dma.done.wait (%p1675_p7), %s335_s26, 2048  }
  0x83   : > { %1284 = vsyncadd (%p1675_p7), %s335_s26, 4294965248  ;;  %p1676_p8 = scmp.eq.s32.totalorder %s1388_s7, 0 }
  0x85   : > { %1286 = dma.done.wait (%p1676_p8), [#allocation7], 2048   ;;  %p1677_p1 = pmov %p1676_p8 }
  0x87   : > { %1288 = vsyncadd (%p1677_p1), [#allocation7], 4294965248  ;;  %p1678_p4 = pmov %p1677_p1 }
  0x88   : > { %p1679_p5 = pmov %p1677_p1 }
  0x89   : > { %1290 = dma.done.wait (%p1678_p4), [#allocation10], 1024  }
  0x8a   : > { %1292 = vsyncadd (%p1679_p5), [#allocation10], 4294966272  ;;  %p1680_p6 = scmp.ne.s32.totalorder %s1388_s7, 0 }
  0x8b   : > { %v1321_v0 = vmov (!%p1680_p6), 0.0  }
  0x8c   : > { %384 = sbr.rel (%p1680_p6) target bundleno = 147 (0x93), region = 72  ;;  %385 = vst [vmem:[#allocation2] sm:$0xff] (!%p1680_p6), %v1321_v0  ;;  %386 = vst [vmem:[#allocation2 + $0x8] sm:$0xff] (!%p1680_p6), %v1321_v0 }
  0x93 PF: > { %v1073_v1 = vld [vmem:[%s1565_s24 + $0x4] ss:$8 sps:$4 sm:$0xff]   ;;  %v1075_v2 = vld [vmem:[%s1565_s24] ss:$8 sps:$4 sm:$0xff]   ;;  %v1322_v3 = vmov 0   ;;  %v388_v20 = vld [vmem:[#allocation2 + $0x8] sm:$0xff] }
  0x94   : > { %518 = vmatprep.mubr.bf16.mxu0 %v1322_v3  ;;  %486 = vmatprep.subr.bf16.mxu0 %v1073_v1  ;;  %v1076_v4 = vld [vmem:[%s1565_s24 + $0x14] ss:$8 sps:$4 sm:$0xff]   ;;  %v1078_v5 = vld [vmem:[%s1565_s24 + $0x10] ss:$8 sps:$4 sm:$0xff]   ;;  %v1079_v6 = vld [vmem:[%s1565_s24 + $0x24] ss:$8 sps:$4 sm:$0xff]  }
  0x95   : > { %487 = vmatpush1.bf16.msra.mxu0 %v1075_v2  ;;  %v1081_v7 = vld [vmem:[%s1565_s24 + $0x20] ss:$8 sps:$4 sm:$0xff]   ;;  %v1082_v8 = vld [vmem:[%s1565_s24 + $0x34] ss:$8 sps:$4 sm:$0xff]   ;;  %v1084_v9 = vld [vmem:[%s1565_s24 + $0x30] ss:$8 sps:$4 sm:$0xff]  }
  0x96   : > { %488 = vmatprep.subr.bf16.mxu0 %v1076_v4  ;;  %v1085_v10 = vld [vmem:[%s1565_s24 + $0x44] ss:$8 sps:$4 sm:$0xff]   ;;  %v1087_v11 = vld [vmem:[%s1565_s24 + $0x40] ss:$8 sps:$4 sm:$0xff]   ;;  %v1088_v12 = vld [vmem:[%s1565_s24 + $0x54] ss:$8 sps:$4 sm:$0xff]  }
  0x97   : > { %v1090_v13 = vld [vmem:[%s1565_s24 + $0x50] ss:$8 sps:$4 sm:$0xff]   ;;  %v1091_v14 = vld [vmem:[%s1565_s24 + $0x64] ss:$8 sps:$4 sm:$0xff]   ;;  %v1093_v15 = vld [vmem:[%s1565_s24 + $0x60] ss:$8 sps:$4 sm:$0xff]  }
  0x98   : > { %v1094_v16 = vld [vmem:[%s1565_s24 + $0x74] ss:$8 sps:$4 sm:$0xff]   ;;  %v1096_v17 = vld [vmem:[%s1565_s24 + $0x70] ss:$8 sps:$4 sm:$0xff]   ;;  %v387_v19 = vld [vmem:[#allocation2] sm:$0xff]  ;;  %p950_p12 = scmp.ne.s32.totalorder %s1388_s7, 1 }
  0x99   : > { %489 = vmatpush1.bf16.msra.mxu0 %v1078_v5  ;;  %v389_v18 = vld [vmem:[%s1558_s30] sm:$0xf]  ;;  %v1097_v27 = vld [vmem:[#allocation8 + $0x40] sm:$0xff] (!%p950_p12)   ;;  %v1099_v29 = vld [vmem:[#allocation8 + $0x48] sm:$0xff] (!%p950_p12)  }
  0x9a   : > { %490 = vmatprep.subr.bf16.mxu0 %v1079_v6  ;;  %v1098_v28 = vld [vmem:[#allocation8] sm:$0xff] (!%p950_p12)   ;;  %v1100_v30 = vld [vmem:[#allocation8 + $0x8] sm:$0xff] (!%p950_p12)   ;;  %v1101_v31 = vld [vmem:[#allocation8 + $0x50] sm:$0xff] (!%p950_p12)  }
  0x9b   : > { %v1102_v32 = vld [vmem:[#allocation8 + $0x10] sm:$0xff] (!%p950_p12)   ;;  %v1103_v33 = vld [vmem:[#allocation8 + $0x58] sm:$0xff] (!%p950_p12)   ;;  %v1105_v35 = vld [vmem:[#allocation8 + $0x60] sm:$0xff] (!%p950_p12)  }
  0x9c   : > { %v1104_v34 = vld [vmem:[#allocation8 + $0x18] sm:$0xff] (!%p950_p12)   ;;  %v1106_v36 = vld [vmem:[#allocation8 + $0x20] sm:$0xff] (!%p950_p12)   ;;  %v1107_v37 = vld [vmem:[#allocation8 + $0x68] sm:$0xff] (!%p950_p12)  }
  0x9d   : > { %491 = vmatpush1.bf16.msra.mxu0 %v1081_v7  ;;  %v1108_v44 = vld [vmem:[#allocation8 + $0x28] sm:$0xff] (!%p950_p12)   ;;  %v1109_v47 = vld [vmem:[#allocation8 + $0x70] sm:$0xff] (!%p950_p12)   ;;  %v1111_v57 = vld [vmem:[#allocation8 + $0x78] sm:$0xff] (!%p950_p12)  }
  0x9e   : > { %492 = vmatprep.subr.bf16.mxu0 %v1082_v8  ;;  %v1110_v54 = vld [vmem:[#allocation8 + $0x30] sm:$0xff] (!%p950_p12)   ;;  %v1112_v0 = vld [vmem:[#allocation8 + $0x38] sm:$0xff] (!%p950_p12)  }
  0xa1   : > { %493 = vmatpush1.bf16.msra.mxu0 %v1084_v9 }
  0xa2   : > { %494 = vmatprep.subr.bf16.mxu0 %v1085_v10 }
  0xa5   : > { %495 = vmatpush1.bf16.msra.mxu0 %v1087_v11 }
  0xa6   : > { %496 = vmatprep.subr.bf16.mxu0 %v1088_v12 }
  0xa9   : > { %497 = vmatpush1.bf16.msra.mxu0 %v1090_v13 }
  0xaa   : > { %498 = vmatprep.subr.bf16.mxu0 %v1091_v14  ;;  %v579_v14 = vlaneseq (!%p950_p12) }
  0xad   : > { %499 = vmatpush1.bf16.msra.mxu0 %v1093_v15 }
  0xae   : > { %500 = vmatprep.subr.bf16.mxu0 %v1094_v16 }
  0xb1   : > { %501 = vmatpush1.bf16.msra.mxu0 %v1096_v17 }
  0xb2   : > { %973 = vmatprep.subr.bf16.mxu0 (!%p950_p12), %v1097_v27  ;;  %v603_v27 = vld [vmem:[%s1661_s3] sm:$0x3] (!%p950_p12) }
  0xb4   : > { %519 = vmatmul.mubr.bf16.vlgmr.msra.gmra.mrb[0].mxu0 %v389_v18 }
  0xb5   : > { %974 = vmatpush3.bf16.msra.mxu0 (!%p950_p12), %v1098_v28 }
  0xb6   : > { %975 = vmatprep.subr.bf16.mxu0 (!%p950_p12), %v1099_v29 }
  0xb9   : > { %976 = vmatpush3.bf16.msra.mxu0 (!%p950_p12), %v1100_v30 }
  0xba   : > { %977 = vmatprep.subr.bf16.mxu0 (!%p950_p12), %v1101_v31 }
  0xbd   : > { %978 = vmatpush3.bf16.msra.mxu0 (!%p950_p12), %v1102_v32 }
  0xbe   : > { %979 = vmatprep.subr.bf16.mxu0 (!%p950_p12), %v1103_v33 }
  0xc1   : > { %980 = vmatpush3.bf16.msra.mxu0 (!%p950_p12), %v1104_v34 }
  0xc2   : > { %981 = vmatprep.subr.bf16.mxu0 (!%p950_p12), %v1105_v35 }
  0xc5   : > { %982 = vmatpush3.bf16.msra.mxu0 (!%p950_p12), %v1106_v36 }
  0xc6   : > { %983 = vmatprep.subr.bf16.mxu0 (!%p950_p12), %v1107_v37 }
  0xc9   : > { %984 = vmatpush3.bf16.msra.mxu0 (!%p950_p12), %v1108_v44 }
  0xca   : > { %985 = vmatprep.subr.bf16.mxu0 (!%p950_p12), %v1109_v47 }
  0xcd   : > { %986 = vmatpush3.bf16.msra.mxu0 (!%p950_p12), %v1110_v54 }
  0xce   : > { %987 = vmatprep.subr.bf16.mxu0 (!%p950_p12), %v1111_v57 }
  0xd1   : > { %988 = vmatpush3.bf16.msra.mxu0 (!%p950_p12), %v1112_v0 }
 0x185   : > { %534 = sbr.rel (%p950_p12) target bundleno = 704 (0x2c0), region = 76 }
 0x187   : > { %v520_v21 = vpop.f32.mrb[0].mxu0 }
 0x188   : > { %v527_v22 = vadd.f32 %v520_v21, %v387_v19  ;;  %v522_v23 = vpop.f32.mrb[1].mxu0  ;;  %v580_v19 = vshrl.u32 (!%p950_p12), %v579_v14, 7 }
 0x189   : > { %v528_v24 = vadd.f32 %v522_v23, %v388_v20  ;;  %v524_v25 = vpop.f32.mrb[2].mxu0 }
 0x18a   : > { %529 = vst [vmem:[#allocation2] sm:$0xff] %v527_v22  ;;  %v525_v26 = vpop.f32.mrb[3].mxu0  ;;  %v585_v21 = vsub.s32 (!%p950_p12), 1, %v580_v19  ;;  %v577_v22 = vld [vmem:[%s1660_s2] sm:$0x3] (!%p950_p12)  ;;  %v581_v23 = vsub.s32 (!%p950_p12), 0, %v580_v19 }
 0x18b   : > { %530 = vst [vmem:[#allocation2 + $0x8] sm:$0xff] %v528_v24 }
 0x18c   : > { %v586_v24 = vrot.slane %v577_v22, %v585_v21  ;;  %v582_v25 = vrot.slane %v577_v22, %v581_v23  ;;  %v612_v34 = vrot.slane %v603_v27, %v585_v21  ;;  %v608_v35 = vrot.slane %v603_v27, %v581_v23 }
 0x191   : > { %v1604_v41 = vld [vmem:[#allocation2] sm:$0xff] }
 0x192   : > { %v1599_v38 = vld [vmem:[#allocation2 + $0x8] sm:$0xff]  ;;  %v537_v42 = vrot.slane %v1604_v41, 4  ;;  %v549_v43 = vmul.f32 %v1604_v41, %v1604_v41 }
 0x193   : > { %v543_v39 = vrot.slane %v1599_v38, 4  ;;  %v550_v40 = vmul.f32 %v1599_v38, %v1599_v38 }
 0x194   : > { %v538_v48 = vadd.f32 %v537_v42, %v1604_v41  ;;  %v551_v49 = vrot.slane %v549_v43, 4 }
 0x195   : > { %v544_v45 = vadd.f32 %v543_v39, %v1599_v38  ;;  %v557_v46 = vrot.slane %v550_v40, 4 }
 0x196   : > { %v539_v52 = vrot.slane %v538_v48, 2  ;;  %v552_v53 = vadd.f32 %v551_v49, %v549_v43 }
 0x197   : > { %v545_v50 = vrot.slane %v544_v45, 2  ;;  %v558_v51 = vadd.f32 %v557_v46, %v550_v40 }
 0x198   : > { %v540_v58 = vadd.f32 %v539_v52, %v538_v48  ;;  %v553_v59 = vrot.slane %v552_v53, 2 }
 0x199   : > { %v546_v55 = vadd.f32 %v545_v50, %v544_v45  ;;  %v559_v56 = vrot.slane %v558_v51, 2 }
 0x19a   : > { %v541_v62 = vrot.slane %v540_v58, 1  ;;  %v554_v63 = vadd.f32 %v553_v59, %v552_v53 }
 0x19b   : > { %v547_v60 = vrot.slane %v546_v55, 1  ;;  %v560_v61 = vadd.f32 %v559_v56, %v558_v51 }
 0x19c   : > { %v542_v3 = vadd.f32 %v541_v62, %v540_v58  ;;  %v555_v4 = vrot.slane %v554_v63, 1 }
 0x19d   : > { %v548_v1 = vadd.f32 %v547_v60, %v546_v55  ;;  %v561_v2 = vrot.slane %v560_v61, 1 }
 0x19e   : > { %v556_v7 = vadd.f32 %v555_v4, %v554_v63  ;;  %v563_v8 = vmul.f32 0.125, %v542_v3 }
 0x19f   : > { %v562_v5 = vadd.f32 %v561_v2, %v560_v61  ;;  %v564_v6 = vmul.f32 0.125, %v548_v1 }
 0x1a0   : > { %v565_v11 = vmul.f32 0.125, %v556_v7  ;;  %v567_v12 = vmul.f32 %v563_v8, %v563_v8  ;;  %v591_v32 = vsub.f32 %v1604_v41, %v563_v8 }
 0x1a1   : > { %v566_v9 = vmul.f32 0.125, %v562_v5  ;;  %v568_v10 = vmul.f32 %v564_v6, %v564_v6  ;;  %v592_v30 = vsub.f32 %v1599_v38, %v564_v6  ;;  %v810_v5 = vld [vmem:[%s1663_s5] sm:$0x1] }
 0x1a2   : > { %v569_v15 = vsub.f32 %v565_v11, %v567_v12 }
 0x1a3   : > { %v570_v13 = vsub.f32 %v566_v9, %v568_v10 }
 0x1a4   : > { %v571_v17 = vmax.f32 %v569_v15, 0.0 }
 0x1a5   : > { %v572_v16 = vmax.f32 %v570_v13, 0.0 }
 0x1a6   : > { %v573_v20 = vadd.f32 1e-05, %v571_v17 }
 0x1a7   : > { %v574_v18 = vadd.f32 1e-05, %v572_v16 }
 0x1a9   : > { %1113 = vrsqrt.f32 %v574_v18 }
 0x1aa   : > { %1115 = vrsqrt.f32 %v573_v20 }
 0x1b3   : > { %v1114_v26 = vpop.eup %1113 }
 0x1b4   : > { %v1116_v28 = vpop.eup %1115  ;;  %v590_v29 = vmul.f32 %v1114_v26, %v586_v24 }
 0x1b5   : > { %v589_v31 = vmul.f32 %v1116_v28, %v582_v25 }
 0x1b6   : > { %v600_v33 = vrot.slane %v590_v29, %v581_v23 }
 0x1b7   : > { %v596_v36 = vrot.slane %v589_v31, %v581_v23 }
 0x1b8   : > { %v602_v37 = vmul.f32 %v600_v33, %v592_v30 }
 0x1b9   : > { %v601_v39 = vmul.f32 %v596_v36, %v591_v32 }
 0x1ba   : > { %v616_v40 = vadd.f32 %v612_v34, %v602_v37 }
 0x1bb   : > { %v615_v42 = vadd.f32 %v608_v35, %v601_v39 }
 0x1bc   : > { %v618_v43 = vmax.f32 %v616_v40, 0.0 }
 0x1bd   : > { %v617_v44 = vmax.f32 %v615_v42, 0.0 }
 0x1be   : > { %v620_v45 = vpack.c.bf16 %v618_v43, %v618_v43 }
 0x1bf   : > { %v619_v46 = vpack.c.bf16 %v617_v44, %v617_v44 }
 0x1c0   : > { %781 = vmatprep.mubr.bf16.mxu0 %v620_v45 }
 0x1c1   : > { %782 = vmatmul.mubr.bf16.vlgmr.msra.gmra.mrb[0].mxu0 %v619_v46 }
 0x294   : > { %v989_v47 = vpop.f32.mrb[0].mxu0 }
 0x295   : > { %v990_v48 = vpop.f32.mrb[1].mxu0 }
 0x296   : > { %v991_v38 = vadd.f32 %v990_v48, %v989_v47  ;;  %v992_v49 = vpop.f32.mrb[2].mxu0 }
 0x297   : > { %v993_v50 = vpop.f32.mrb[3].mxu0 }
 0x298   : > { %v789_v41 = vrot.slane %v991_v38, 4  ;;  %v795_v51 = vmul.f32 %v991_v38, %v991_v38 }
 0x29a   : > { %v790_v52 = vadd.f32 %v991_v38, %v789_v41  ;;  %v796_v53 = vrot.slane %v795_v51, 4 }
 0x29c   : > { %v791_v54 = vrot.slane %v790_v52, 2  ;;  %v797_v55 = vadd.f32 %v796_v53, %v795_v51 }
 0x29e   : > { %v792_v56 = vadd.f32 %v791_v54, %v790_v52  ;;  %v798_v57 = vrot.slane %v797_v55, 2 }
 0x2a0   : > { %v793_v58 = vrot.slane %v792_v56, 1  ;;  %v799_v59 = vadd.f32 %v798_v57, %v797_v55 }
 0x2a2   : > { %v794_v60 = vadd.f32 %v793_v58, %v792_v56  ;;  %v800_v61 = vrot.slane %v799_v59, 1 }
 0x2a4   : > { %v801_v62 = vadd.f32 %v800_v61, %v799_v59  ;;  %v802_v63 = vmul.f32 0.125, %v794_v60 }
 0x2a6   : > { %v803_v0 = vmul.f32 0.125, %v801_v62  ;;  %v804_v1 = vmul.f32 %v802_v63, %v802_v63  ;;  %v807_v8 = vsub.f32 %v991_v38, %v802_v63 }
 0x2a8   : > { %v805_v2 = vsub.f32 %v803_v0, %v804_v1 }
 0x2aa   : > { %v806_v3 = vmax.f32 %v805_v2, 0.0 }
 0x2ac   : > { %v808_v4 = vadd.f32 1e-05, %v806_v3 }
 0x2ae   : > { %1117 = vrsqrt.f32 %v808_v4 }
 0x2b8   : > { %v1118_v6 = vpop.eup %1117 }
 0x2b9   : > { %v811_v7 = vmul.f32 %v1118_v6, %v810_v5 }
 0x2bb   : > { %v815_v9 = vrot.slane %v811_v7, %v581_v23 }
 0x2bd   : > { %v816_v10 = vmul.f32 %v815_v9, %v807_v8 }
 0x2bf   : > { %817 = vst [vmem:[#allocation11] sm:$0xff] %v816_v10 }
 0x2c0 PF: > { %p1030_p0 = scmp.eq.s32.totalorder %s1388_s7, 1  ;;  %s1323_s13 = smov [#allocation11]  }
 0x2c1   : > { %s825_s14 = sshll.u32 %s1323_s13, 4  ;;  %s826_s14 = int_to_ptr.vmem [resolvable:$true] %s825_s14 }
 0x2c2   : > { %s1235_s16 = scalar_lea.vmem %s826_s14, 128  ;;  %p1242_p10 = scmp.lt.s32.totalorder %s826_s14, %s826_s14 }
 0x2c3   : > { %p1236_p2 = scmp.ne.s32.totalorder %s826_s14, %s1235_s16  ;;  %p1243_p9 = scmp.lt.s32.totalorder %s1235_s16, %s1235_s16 }
 0x2c5   : > { %p1237_p13 = pnand %p1236_p2, %p1030_p0  ;;  %p1244_p11 = por %p1243_p9, %p1242_p10 }
 0x2c7   : > { %p1238_p3 = pneg %p1237_p13 }
 0x2c9   : > { %p1245_p7 = pnand %p1244_p11, %p1238_p3 }
 0x2cb   : > { %1248 = shalt.err (!%p1245_p7)
}
 0x2cc   : > { %s1249_s27 = scalar_lea.hbm %s1666_s8, 128 }
 0x2cd   : > { %p1250_p8 = scmp.ne.s32.totalorder %s1666_s8, %s1249_s27  ;;  %p1255_p5 = scmp.lt.u32.totalorder %s1249_s27, %s1666_s8 }
 0x2cf   : > { %p1251_p1 = pnand %p1250_p8, %p1030_p0 }
 0x2d1   : > { %p1252_p4 = pneg %p1251_p1 }
 0x2d3   : > { %p1257_p6 = pnand %p1255_p5, %p1252_p4 }
 0x2d5   : > { %1260 = shalt.err (!%p1257_p6)
}
 0x2d6   : > { %1008 = dma.vmem_to_hbm [thread:$0]  (%p1030_p0), %s826_s14, 128, %s1666_s8, [#allocation5]  }
 0x2d7   : > { %1294 = dma.done.wait (%p1030_p0), [#allocation5], 128  }
 0x2d8   : > { %1296 = vsyncadd (%p1030_p0), [#allocation5], 4294967168 }
 0x2d9 PF: > { %p23_p12 = scmp.ge.s32.totalorder %s1463_s23, 4   ;;  %s1681_s27 = smov %s1303_s28 }
 0x2da   : > { %s1682_s28 = smov %s1307_s29  ;;  %s1683_s29 = smov %s1476_s11 }
 0x2db   : > { %s1684_s30 = smov %s1463_s23  ;;  %25 = sbr.rel (!%p23_p12) target bundleno = 7 (0x7), region = 118 }
 0x2e2   :  { %838 = vsyncpa [#allocation4], 1 }
 0x2e3   :  { %840 = vsyncpa [#allocation4 + $0x1], 1 }
 0x2e4   :  { %841 = vsyncpa [#allocation7], 1 }
 0x2e5   :  { %843 = vsyncpa [#allocation7 + $0x1], 1 }
 0x2e6   :  { %844 = vsyncpa [#allocation10], 1 }
 0x2e7   :  { %845 = vsyncpa [#allocation5], 1 }
 0x2e8   :  { %847 = vsyncpa [#allocation5 + $0x1], 1 }

</bundles_post_ra>
